<compile_context>
chip_gen: v7x
topology: tpu7x:2x2x1
jax: 0.10.0
libtpu: 0.0.40
codegen_flags: <defaults>
</compile_context>

<pallas_src>
import jax
import jax.numpy as jnp
from jax.experimental import pallas as pl
from jax.experimental.pallas import tpu as pltpu

INPUT_SIZE = 16
HIDDEN = 32           # H
OUTPUT = 8
NUM_LAYERS = 4
BN_EPS = 1e-5
MLP_W = 2 * HIDDEN    # 64: widest MLP activation; MLP tiles padded to (64, 64)


# ----------------------------- Pallas kernel ------------------------------- #
def _mymodel_kernel(x_ref, wg_ref, bg_ref, wm_ref, bm_ref, out_ref):
    H = HIDDEN
    h = x_ref[...]                                    # (B, 32): layer-0 input zero-padded to H

    # GRU stack: one cell step per layer, h_prev == 0.
    for layer in range(NUM_LAYERS):
        # One matmul per layer: lanes [0:96] are the gate pre-activations
        # (x @ Wih, gate order [r, z, n]); weight lanes [96:128] are zero, so
        # after the packed bias-row add they hold b_hh_n exactly.
        g = jnp.dot(h, wg_ref[layer], preferred_element_type=jnp.float32)   # (B, 128)
        g = g + bg_ref[layer:layer + 1, :]
        r = jax.nn.sigmoid(g[:, 0:H])
        z = jax.nn.sigmoid(g[:, H:2 * H])
        n = jnp.tanh(g[:, 2 * H:3 * H] + r * g[:, 3 * H:4 * H])
        h = (1.0 - z) * n                             # + z * h_prev dropped (h_prev == 0)

    # MLP head: Linear(+folded BN) -> ReLU  x3, then final Linear.
    # Padded rows/cols of the (64,64) weight tiles are zero, so the unused
    # lanes of y stay exactly zero through every ReLU.
    y = jnp.dot(h, wm_ref[0][:H, :], preferred_element_type=jnp.float32) + bm_ref[0:1, :]
    y = jnp.maximum(y, 0.0)
    y = jnp.dot(y, wm_ref[1], preferred_element_type=jnp.float32) + bm_ref[1:2, :]
    y = jnp.maximum(y, 0.0)
    y = jnp.dot(y, wm_ref[2], preferred_element_type=jnp.float32) + bm_ref[2:3, :]
    y = jnp.maximum(y, 0.0)
    y = jnp.dot(y, wm_ref[3], preferred_element_type=jnp.float32) + bm_ref[3:4, :]
    out_ref[...] = y[:, :OUTPUT]


# ------------------------- Host-side parameter packing ---------------------- #
def pack_params(params):
    (wih0, whh0, bih0, bhh0,
     wih1, whh1, bih1, bhh1,
     wih2, whh2, bih2, bhh2,
     wih3, whh3, bih3, bhh3,
     w1, b1, g1, be1, m1, v1,
     w2, b2, g2, be2, m2, v2,
     w3, b3, g3, be3, m3, v3,
     w4, b4) = params

    H = HIDDEN

    # --- GRU: h_prev == 0 => W_hh matmuls are dead; gh == b_hh exactly. ---
    wg_rows, bg_rows = [], []
    for (wih, bih, bhh) in ((wih0, bih0, bhh0), (wih1, bih1, bhh1),
                            (wih2, bih2, bhh2), (wih3, bih3, bhh3)):
        w = jnp.zeros((H, 4 * H), jnp.float32)
        w = w.at[:wih.shape[0], :3 * H].set(wih)      # lanes [96:128] stay zero
        wg_rows.append(w)
        b = jnp.concatenate([
            (bih + bhh)[0, :2 * H],                   # r, z: combined bias
            bih[0, 2 * H:3 * H],                      # n: input bias
            bhh[0, 2 * H:3 * H],                      # n: hidden bias (scaled by r in-kernel)
        ], axis=0)
        bg_rows.append(b)
    w_gru = jnp.stack(wg_rows)                        # (4, 32, 128)
    b_gru = jnp.stack(bg_rows)                        # (4, 128)

    # --- MLP: fold eval-mode BatchNorm into the preceding Linear. ---
    def fold(w, b, g, be, m, v):
        s = g[0] * jax.lax.rsqrt(v[0] + BN_EPS)
        return w * s[None, :], (b[0] - m[0]) * s + be[0]

    w1f, b1f = fold(w1, b1, g1, be1, m1, v1)          # (32,32), (32,)
    w2f, b2f = fold(w2, b2, g2, be2, m2, v2)          # (32,64), (64,)
    w3f, b3f = fold(w3, b3, g3, be3, m3, v3)          # (64,32), (32,)
    w4f, b4f = w4, b4[0]                              # (32, 8), (8,)

    def pad_w(w):
        out = jnp.zeros((MLP_W, MLP_W), jnp.float32)
        return out.at[:w.shape[0], :w.shape[1]].set(w)

    def pad_b(b):
        out = jnp.zeros((MLP_W,), jnp.float32)
        return out.at[:b.shape[0]].set(b)

    w_mlp = jnp.stack([pad_w(w1f), pad_w(w2f), pad_w(w3f), pad_w(w4f)])   # (4, 64, 64)
    b_mlp = jnp.stack([pad_b(b1f), pad_b(b2f), pad_b(b3f), pad_b(b4f)])   # (4, 64)
    return w_gru, b_gru, w_mlp, b_mlp


# ------------------------------- Wrapper ------------------------------------ #
def mymodel_forward(x, packed):
    w_gru, b_gru, w_mlp, b_mlp = packed
    B = x.shape[0]
    x_pad = jnp.pad(x, ((0, 0), (0, HIDDEN - INPUT_SIZE)))   # (B, 32), zero pad
    vmem = pl.BlockSpec(memory_space=pltpu.MemorySpace.VMEM)
    return pl.pallas_call(
        _mymodel_kernel,
        out_shape=jax.ShapeDtypeStruct((B, OUTPUT), jnp.float32),
        in_specs=[vmem] * 5,
        out_specs=vmem,
    )(x_pad, w_gru, b_gru, w_mlp, b_mlp)


# ------------------------ Deterministic parameter init ---------------------- #
def init_params(key):
    keys = iter(jax.random.split(key, 64))

    def unif(shape, scale):
        return jax.random.uniform(next(keys), shape, jnp.float32, -scale, scale)

    params = []
    k_gru = float(1.0 / HIDDEN ** 0.5)
    # GRU layers: weight_ih^T (in, 3H), weight_hh^T (H, 3H), bias_ih (1,3H), bias_hh (1,3H)
    for layer in range(NUM_LAYERS):
        in_sz = INPUT_SIZE if layer == 0 else HIDDEN
        params += [unif((in_sz, 3 * HIDDEN), k_gru),
                   unif((HIDDEN, 3 * HIDDEN), k_gru),
                   unif((1, 3 * HIDDEN), k_gru),
                   unif((1, 3 * HIDDEN), k_gru)]

    def linear(in_f, out_f):
        k = float(1.0 / in_f ** 0.5)
        return [unif((in_f, out_f), k), unif((1, out_f), k)]

    def bn_params(c):
        g = 1.0 + 0.1 * jax.random.normal(next(keys), (1, c), jnp.float32)
        b = 0.1 * jax.random.normal(next(keys), (1, c), jnp.float32)
        m = 0.1 * jax.random.normal(next(keys), (1, c), jnp.float32)
        v = 1.0 + 0.1 * jax.random.uniform(next(keys), (1, c), jnp.float32)
        return [g, b, m, v]

    params += linear(HIDDEN, HIDDEN) + bn_params(HIDDEN)
    params += linear(HIDDEN, 2 * HIDDEN) + bn_params(2 * HIDDEN)
    params += linear(2 * HIDDEN, HIDDEN) + bn_params(HIDDEN)
    params += linear(HIDDEN, OUTPUT)
    return params


# ----------------------------- Pure-JAX reference --------------------------- #
def reference_forward(x, params):
    (wih0, whh0, bih0, bhh0,
     wih1, whh1, bih1, bhh1,
     wih2, whh2, bih2, bhh2,
     wih3, whh3, bih3, bhh3,
     w1, b1, g1, be1, m1, v1,
     w2, b2, g2, be2, m2, v2,
     w3, b3, g3, be3, m3, v3,
     w4, b4) = params

    H = HIDDEN
    B = x.shape[0]
    h0 = jnp.zeros((B, H), jnp.float32)

    def gru_cell(xin, h_prev, wih, whh, bih, bhh):
        gi = xin @ wih + bih
        gh = h_prev @ whh + bhh
        r = jax.nn.sigmoid(gi[:, 0:H] + gh[:, 0:H])
        z = jax.nn.sigmoid(gi[:, H:2 * H] + gh[:, H:2 * H])
        n = jnp.tanh(gi[:, 2 * H:3 * H] + r * gh[:, 2 * H:3 * H])
        return (1.0 - z) * n + z * h_prev

    h = gru_cell(x, h0, wih0, whh0, bih0, bhh0)
    h = gru_cell(h, h0, wih1, whh1, bih1, bhh1)
    h = gru_cell(h, h0, wih2, whh2, bih2, bhh2)
    h = gru_cell(h, h0, wih3, whh3, bih3, bhh3)

    def bn(y, g, be, m, v):
        return (y - m) * jax.lax.rsqrt(v + BN_EPS) * g + be

    y = jnp.maximum(bn(h @ w1 + b1, g1, be1, m1, v1), 0.0)
    y = jnp.maximum(bn(y @ w2 + b2, g2, be2, m2, v2), 0.0)
    y = jnp.maximum(bn(y @ w3 + b3, g3, be3, m3, v3), 0.0)
    return y @ w4 + b4


# --------------------------------- Main -------------------------------------- #
if __name__ == "__main__":
    key = jax.random.PRNGKey(0)
    pkey, xkey = jax.random.split(key)
    params = init_params(pkey)
    packed = pack_params(params)
    x = jax.random.normal(xkey, (8, INPUT_SIZE), jnp.float32)

    out = jax.block_until_ready(mymodel_forward(x, packed))
    ref = reference_forward(x, params)

    assert out.shape == (8, OUTPUT), out.shape
    assert jnp.allclose(out, ref, atol=1e-4, rtol=1e-4), float(jnp.abs(out - ref).max())
    print("KERNEL_OK")
</pallas_src>

<mosaic_0001>
module attributes {stable_mosaic.version = 11 : i64} {
  func.func @_mymodel_kernel(%arg0: memref<8x32xf32, #tpu.memory_space<vmem>>, %arg1: memref<4x32x128xf32, #tpu.memory_space<vmem>>, %arg2: memref<4x128xf32, #tpu.memory_space<vmem>>, %arg3: memref<4x64x64xf32, #tpu.memory_space<vmem>>, %arg4: memref<4x64xf32, #tpu.memory_space<vmem>>, %arg5: memref<8x8xf32, #tpu.memory_space<vmem>>) attributes {dimension_semantics = [], scalar_prefetch = 0 : i64, scratch_operands = 0 : i64, tpu.core_type = #tpu.core_type<tc>} {
    %c0 = arith.constant 0 : index
    %c0_0 = arith.constant 0 : index
    %0 = vector.load %arg0[%c0, %c0_0] : memref<8x32xf32, #tpu.memory_space<vmem>>, vector<8x32xf32>
    %c0_1 = arith.constant 0 : index
    %c0_2 = arith.constant 0 : index
    %c0_3 = arith.constant 0 : index
    %1 = vector.load %arg1[%c0_1, %c0_2, %c0_3] : memref<4x32x128xf32, #tpu.memory_space<vmem>>, vector<1x32x128xf32>
    %2 = vector.shape_cast %1 : vector<1x32x128xf32> to vector<32x128xf32>
    %cst = arith.constant dense<0.000000e+00> : vector<8x128xf32>
    %3 = tpu.matmul %0, %2, %cst {dimension_numbers = #tpu.dot_dimension_numbers<[1], [0], [0], [1], [0, 0, 1, 1], [], []>} : vector<8x32xf32>, vector<32x128xf32>, vector<8x128xf32> -> vector<8x128xf32>
    %c0_4 = arith.constant 0 : index
    %c0_5 = arith.constant 0 : index
    %4 = vector.load %arg2[%c0_4, %c0_5] : memref<4x128xf32, #tpu.memory_space<vmem>>, vector<1x128xf32>
    %5 = vector.broadcast %4 : vector<1x128xf32> to vector<8x128xf32>
    %6 = arith.addf %3, %5 : vector<8x128xf32>
    %7 = vector.extract_strided_slice %6 {offsets = [0, 0], sizes = [8, 32], strides = [1, 1]} : vector<8x128xf32> to vector<8x32xf32>
    %8 = arith.negf %7 : vector<8x32xf32>
    %9 = math.exp %8 : vector<8x32xf32>
    %cst_6 = arith.constant 1.000000e+00 : f32
    %10 = vector.broadcast %cst_6 : f32 to vector<8x32xf32>
    %11 = arith.addf %10, %9 : vector<8x32xf32>
    %12 = arith.divf %10, %11 : vector<8x32xf32>
    %13 = vector.extract_strided_slice %6 {offsets = [0, 32], sizes = [8, 32], strides = [1, 1]} : vector<8x128xf32> to vector<8x32xf32>
    %14 = arith.negf %13 : vector<8x32xf32>
    %15 = math.exp %14 : vector<8x32xf32>
    %cst_7 = arith.constant 1.000000e+00 : f32
    %16 = vector.broadcast %cst_7 : f32 to vector<8x32xf32>
    %17 = arith.addf %16, %15 : vector<8x32xf32>
    %18 = arith.divf %16, %17 : vector<8x32xf32>
    %19 = vector.extract_strided_slice %6 {offsets = [0, 64], sizes = [8, 32], strides = [1, 1]} : vector<8x128xf32> to vector<8x32xf32>
    %20 = vector.extract_strided_slice %6 {offsets = [0, 96], sizes = [8, 32], strides = [1, 1]} : vector<8x128xf32> to vector<8x32xf32>
    %21 = arith.mulf %12, %20 : vector<8x32xf32>
    %22 = arith.addf %19, %21 : vector<8x32xf32>
    %23 = math.tanh %22 : vector<8x32xf32>
    %cst_8 = arith.constant 1.000000e+00 : f32
    %24 = vector.broadcast %cst_8 : f32 to vector<8x32xf32>
    %25 = arith.subf %24, %18 : vector<8x32xf32>
    %26 = arith.mulf %25, %23 : vector<8x32xf32>
    %c1 = arith.constant 1 : index
    %c0_9 = arith.constant 0 : index
    %c0_10 = arith.constant 0 : index
    %27 = vector.load %arg1[%c1, %c0_9, %c0_10] : memref<4x32x128xf32, #tpu.memory_space<vmem>>, vector<1x32x128xf32>
    %28 = vector.shape_cast %27 : vector<1x32x128xf32> to vector<32x128xf32>
    %cst_11 = arith.constant dense<0.000000e+00> : vector<8x128xf32>
    %29 = tpu.matmul %26, %28, %cst_11 {dimension_numbers = #tpu.dot_dimension_numbers<[1], [0], [0], [1], [0, 0, 1, 1], [], []>} : vector<8x32xf32>, vector<32x128xf32>, vector<8x128xf32> -> vector<8x128xf32>
    %c1_12 = arith.constant 1 : index
    %c0_13 = arith.constant 0 : index
    %30 = vector.load %arg2[%c1_12, %c0_13] : memref<4x128xf32, #tpu.memory_space<vmem>>, vector<1x128xf32>
    %31 = vector.broadcast %30 : vector<1x128xf32> to vector<8x128xf32>
    %32 = arith.addf %29, %31 : vector<8x128xf32>
    %33 = vector.extract_strided_slice %32 {offsets = [0, 0], sizes = [8, 32], strides = [1, 1]} : vector<8x128xf32> to vector<8x32xf32>
    %34 = arith.negf %33 : vector<8x32xf32>
    %35 = math.exp %34 : vector<8x32xf32>
    %cst_14 = arith.constant 1.000000e+00 : f32
    %36 = vector.broadcast %cst_14 : f32 to vector<8x32xf32>
    %37 = arith.addf %36, %35 : vector<8x32xf32>
    %38 = arith.divf %36, %37 : vector<8x32xf32>
    %39 = vector.extract_strided_slice %32 {offsets = [0, 32], sizes = [8, 32], strides = [1, 1]} : vector<8x128xf32> to vector<8x32xf32>
    %40 = arith.negf %39 : vector<8x32xf32>
    %41 = math.exp %40 : vector<8x32xf32>
    %cst_15 = arith.constant 1.000000e+00 : f32
    %42 = vector.broadcast %cst_15 : f32 to vector<8x32xf32>
    %43 = arith.addf %42, %41 : vector<8x32xf32>
    %44 = arith.divf %42, %43 : vector<8x32xf32>
    %45 = vector.extract_strided_slice %32 {offsets = [0, 64], sizes = [8, 32], strides = [1, 1]} : vector<8x128xf32> to vector<8x32xf32>
    %46 = vector.extract_strided_slice %32 {offsets = [0, 96], sizes = [8, 32], strides = [1, 1]} : vector<8x128xf32> to vector<8x32xf32>
    %47 = arith.mulf %38, %46 : vector<8x32xf32>
    %48 = arith.addf %45, %47 : vector<8x32xf32>
    %49 = math.tanh %48 : vector<8x32xf32>
    %cst_16 = arith.constant 1.000000e+00 : f32
    %50 = vector.broadcast %cst_16 : f32 to vector<8x32xf32>
    %51 = arith.subf %50, %44 : vector<8x32xf32>
    %52 = arith.mulf %51, %49 : vector<8x32xf32>
    %c2 = arith.constant 2 : index
    %c0_17 = arith.constant 0 : index
    %c0_18 = arith.constant 0 : index
    %53 = vector.load %arg1[%c2, %c0_17, %c0_18] : memref<4x32x128xf32, #tpu.memory_space<vmem>>, vector<1x32x128xf32>
    %54 = vector.shape_cast %53 : vector<1x32x128xf32> to vector<32x128xf32>
    %cst_19 = arith.constant dense<0.000000e+00> : vector<8x128xf32>
    %55 = tpu.matmul %52, %54, %cst_19 {dimension_numbers = #tpu.dot_dimension_numbers<[1], [0], [0], [1], [0, 0, 1, 1], [], []>} : vector<8x32xf32>, vector<32x128xf32>, vector<8x128xf32> -> vector<8x128xf32>
    %c2_20 = arith.constant 2 : index
    %c0_21 = arith.constant 0 : index
    %56 = vector.load %arg2[%c2_20, %c0_21] : memref<4x128xf32, #tpu.memory_space<vmem>>, vector<1x128xf32>
    %57 = vector.broadcast %56 : vector<1x128xf32> to vector<8x128xf32>
    %58 = arith.addf %55, %57 : vector<8x128xf32>
    %59 = vector.extract_strided_slice %58 {offsets = [0, 0], sizes = [8, 32], strides = [1, 1]} : vector<8x128xf32> to vector<8x32xf32>
    %60 = arith.negf %59 : vector<8x32xf32>
    %61 = math.exp %60 : vector<8x32xf32>
    %cst_22 = arith.constant 1.000000e+00 : f32
    %62 = vector.broadcast %cst_22 : f32 to vector<8x32xf32>
    %63 = arith.addf %62, %61 : vector<8x32xf32>
    %64 = arith.divf %62, %63 : vector<8x32xf32>
    %65 = vector.extract_strided_slice %58 {offsets = [0, 32], sizes = [8, 32], strides = [1, 1]} : vector<8x128xf32> to vector<8x32xf32>
    %66 = arith.negf %65 : vector<8x32xf32>
    %67 = math.exp %66 : vector<8x32xf32>
    %cst_23 = arith.constant 1.000000e+00 : f32
    %68 = vector.broadcast %cst_23 : f32 to vector<8x32xf32>
    %69 = arith.addf %68, %67 : vector<8x32xf32>
    %70 = arith.divf %68, %69 : vector<8x32xf32>
    %71 = vector.extract_strided_slice %58 {offsets = [0, 64], sizes = [8, 32], strides = [1, 1]} : vector<8x128xf32> to vector<8x32xf32>
    %72 = vector.extract_strided_slice %58 {offsets = [0, 96], sizes = [8, 32], strides = [1, 1]} : vector<8x128xf32> to vector<8x32xf32>
    %73 = arith.mulf %64, %72 : vector<8x32xf32>
    %74 = arith.addf %71, %73 : vector<8x32xf32>
    %75 = math.tanh %74 : vector<8x32xf32>
    %cst_24 = arith.constant 1.000000e+00 : f32
    %76 = vector.broadcast %cst_24 : f32 to vector<8x32xf32>
    %77 = arith.subf %76, %70 : vector<8x32xf32>
    %78 = arith.mulf %77, %75 : vector<8x32xf32>
    %c3 = arith.constant 3 : index
    %c0_25 = arith.constant 0 : index
    %c0_26 = arith.constant 0 : index
    %79 = vector.load %arg1[%c3, %c0_25, %c0_26] : memref<4x32x128xf32, #tpu.memory_space<vmem>>, vector<1x32x128xf32>
    %80 = vector.shape_cast %79 : vector<1x32x128xf32> to vector<32x128xf32>
    %cst_27 = arith.constant dense<0.000000e+00> : vector<8x128xf32>
    %81 = tpu.matmul %78, %80, %cst_27 {dimension_numbers = #tpu.dot_dimension_numbers<[1], [0], [0], [1], [0, 0, 1, 1], [], []>} : vector<8x32xf32>, vector<32x128xf32>, vector<8x128xf32> -> vector<8x128xf32>
    %c3_28 = arith.constant 3 : index
    %c0_29 = arith.constant 0 : index
    %82 = vector.load %arg2[%c3_28, %c0_29] : memref<4x128xf32, #tpu.memory_space<vmem>>, vector<1x128xf32>
    %83 = vector.broadcast %82 : vector<1x128xf32> to vector<8x128xf32>
    %84 = arith.addf %81, %83 : vector<8x128xf32>
    %85 = vector.extract_strided_slice %84 {offsets = [0, 0], sizes = [8, 32], strides = [1, 1]} : vector<8x128xf32> to vector<8x32xf32>
    %86 = arith.negf %85 : vector<8x32xf32>
    %87 = math.exp %86 : vector<8x32xf32>
    %cst_30 = arith.constant 1.000000e+00 : f32
    %88 = vector.broadcast %cst_30 : f32 to vector<8x32xf32>
    %89 = arith.addf %88, %87 : vector<8x32xf32>
    %90 = arith.divf %88, %89 : vector<8x32xf32>
    %91 = vector.extract_strided_slice %84 {offsets = [0, 32], sizes = [8, 32], strides = [1, 1]} : vector<8x128xf32> to vector<8x32xf32>
    %92 = arith.negf %91 : vector<8x32xf32>
    %93 = math.exp %92 : vector<8x32xf32>
    %cst_31 = arith.constant 1.000000e+00 : f32
    %94 = vector.broadcast %cst_31 : f32 to vector<8x32xf32>
    %95 = arith.addf %94, %93 : vector<8x32xf32>
    %96 = arith.divf %94, %95 : vector<8x32xf32>
    %97 = vector.extract_strided_slice %84 {offsets = [0, 64], sizes = [8, 32], strides = [1, 1]} : vector<8x128xf32> to vector<8x32xf32>
    %98 = vector.extract_strided_slice %84 {offsets = [0, 96], sizes = [8, 32], strides = [1, 1]} : vector<8x128xf32> to vector<8x32xf32>
    %99 = arith.mulf %90, %98 : vector<8x32xf32>
    %100 = arith.addf %97, %99 : vector<8x32xf32>
    %101 = math.tanh %100 : vector<8x32xf32>
    %cst_32 = arith.constant 1.000000e+00 : f32
    %102 = vector.broadcast %cst_32 : f32 to vector<8x32xf32>
    %103 = arith.subf %102, %96 : vector<8x32xf32>
    %104 = arith.mulf %103, %101 : vector<8x32xf32>
    %c0_33 = arith.constant 0 : index
    %c0_34 = arith.constant 0 : index
    %c0_35 = arith.constant 0 : index
    %105 = vector.load %arg3[%c0_33, %c0_34, %c0_35] : memref<4x64x64xf32, #tpu.memory_space<vmem>>, vector<1x64x64xf32>
    %106 = vector.shape_cast %105 : vector<1x64x64xf32> to vector<64x64xf32>
    %107 = vector.extract_strided_slice %106 {offsets = [0, 0], sizes = [32, 64], strides = [1, 1]} : vector<64x64xf32> to vector<32x64xf32>
    %cst_36 = arith.constant dense<0.000000e+00> : vector<8x64xf32>
    %108 = tpu.matmul %104, %107, %cst_36 {dimension_numbers = #tpu.dot_dimension_numbers<[1], [0], [0], [1], [0, 0, 1, 1], [], []>} : vector<8x32xf32>, vector<32x64xf32>, vector<8x64xf32> -> vector<8x64xf32>
    %c0_37 = arith.constant 0 : index
    %c0_38 = arith.constant 0 : index
    %109 = vector.load %arg4[%c0_37, %c0_38] : memref<4x64xf32, #tpu.memory_space<vmem>>, vector<1x64xf32>
    %110 = vector.broadcast %109 : vector<1x64xf32> to vector<8x64xf32>
    %111 = arith.addf %108, %110 : vector<8x64xf32>
    %cst_39 = arith.constant 0.000000e+00 : f32
    %112 = vector.broadcast %cst_39 : f32 to vector<8x64xf32>
    %113 = arith.maximumf %111, %112 : vector<8x64xf32>
    %c1_40 = arith.constant 1 : index
    %c0_41 = arith.constant 0 : index
    %c0_42 = arith.constant 0 : index
    %114 = vector.load %arg3[%c1_40, %c0_41, %c0_42] : memref<4x64x64xf32, #tpu.memory_space<vmem>>, vector<1x64x64xf32>
    %115 = vector.shape_cast %114 : vector<1x64x64xf32> to vector<64x64xf32>
    %cst_43 = arith.constant dense<0.000000e+00> : vector<8x64xf32>
    %116 = tpu.matmul %113, %115, %cst_43 {dimension_numbers = #tpu.dot_dimension_numbers<[1], [0], [0], [1], [0, 0, 1, 1], [], []>} : vector<8x64xf32>, vector<64x64xf32>, vector<8x64xf32> -> vector<8x64xf32>
    %c1_44 = arith.constant 1 : index
    %c0_45 = arith.constant 0 : index
    %117 = vector.load %arg4[%c1_44, %c0_45] : memref<4x64xf32, #tpu.memory_space<vmem>>, vector<1x64xf32>
    %118 = vector.broadcast %117 : vector<1x64xf32> to vector<8x64xf32>
    %119 = arith.addf %116, %118 : vector<8x64xf32>
    %cst_46 = arith.constant 0.000000e+00 : f32
    %120 = vector.broadcast %cst_46 : f32 to vector<8x64xf32>
    %121 = arith.maximumf %119, %120 : vector<8x64xf32>
    %c2_47 = arith.constant 2 : index
    %c0_48 = arith.constant 0 : index
    %c0_49 = arith.constant 0 : index
    %122 = vector.load %arg3[%c2_47, %c0_48, %c0_49] : memref<4x64x64xf32, #tpu.memory_space<vmem>>, vector<1x64x64xf32>
    %123 = vector.shape_cast %122 : vector<1x64x64xf32> to vector<64x64xf32>
    %cst_50 = arith.constant dense<0.000000e+00> : vector<8x64xf32>
    %124 = tpu.matmul %121, %123, %cst_50 {dimension_numbers = #tpu.dot_dimension_numbers<[1], [0], [0], [1], [0, 0, 1, 1], [], []>} : vector<8x64xf32>, vector<64x64xf32>, vector<8x64xf32> -> vector<8x64xf32>
    %c2_51 = arith.constant 2 : index
    %c0_52 = arith.constant 0 : index
    %125 = vector.load %arg4[%c2_51, %c0_52] : memref<4x64xf32, #tpu.memory_space<vmem>>, vector<1x64xf32>
    %126 = vector.broadcast %125 : vector<1x64xf32> to vector<8x64xf32>
    %127 = arith.addf %124, %126 : vector<8x64xf32>
    %cst_53 = arith.constant 0.000000e+00 : f32
    %128 = vector.broadcast %cst_53 : f32 to vector<8x64xf32>
    %129 = arith.maximumf %127, %128 : vector<8x64xf32>
    %c3_54 = arith.constant 3 : index
    %c0_55 = arith.constant 0 : index
    %c0_56 = arith.constant 0 : index
    %130 = vector.load %arg3[%c3_54, %c0_55, %c0_56] : memref<4x64x64xf32, #tpu.memory_space<vmem>>, vector<1x64x64xf32>
    %131 = vector.shape_cast %130 : vector<1x64x64xf32> to vector<64x64xf32>
    %cst_57 = arith.constant dense<0.000000e+00> : vector<8x64xf32>
    %132 = tpu.matmul %129, %131, %cst_57 {dimension_numbers = #tpu.dot_dimension_numbers<[1], [0], [0], [1], [0, 0, 1, 1], [], []>} : vector<8x64xf32>, vector<64x64xf32>, vector<8x64xf32> -> vector<8x64xf32>
    %c3_58 = arith.constant 3 : index
    %c0_59 = arith.constant 0 : index
    %133 = vector.load %arg4[%c3_58, %c0_59] : memref<4x64xf32, #tpu.memory_space<vmem>>, vector<1x64xf32>
    %134 = vector.broadcast %133 : vector<1x64xf32> to vector<8x64xf32>
    %135 = arith.addf %132, %134 : vector<8x64xf32>
    %136 = vector.extract_strided_slice %135 {offsets = [0, 0], sizes = [8, 8], strides = [1, 1]} : vector<8x64xf32> to vector<8x8xf32>
    %c0_60 = arith.constant 0 : index
    %c0_61 = arith.constant 0 : index
    %137 = vector.load %arg5[%c0_60, %c0_61] : memref<8x8xf32, #tpu.memory_space<vmem>>, vector<8x8xf32>
    tpu.vector_store %arg5[%c0_60, %c0_61], %136 {strides = array<i32>} : memref<8x8xf32, #tpu.memory_space<vmem>>, vector<8x8xf32>,
    return
  }
}

</mosaic_0001>

<bundles_post_ra>
// kernel: tpu_custom_call.1
= control target key start
LH: loop header
LB: loop body
LE: loop exit
PB: predicated region body
PF: predicated region fallthrough
CT: control target
= control target key end

     0   :  { %10 = vsyncpa [#allocation3], 0  ;;  %s1420_s0 = inlined_call_operand.hbm [shape: f32[8,32], index: 0, kind: input, shape index: {}]   ;;  %s1421_s1 = inlined_call_operand.hbm [shape: f32[4,32,128], index: 1, kind: input, shape index: {}]   ;;  %s1422_s2 = inlined_call_operand.vmem [shape: f32[4,128], index: 2, kind: input, shape index: {}]   ;;  %s1423_s3 = inlined_call_operand.hbm [shape: f32[4,64,64], index: 3, kind: input, shape index: {}]   ;;  %s1424_s4 = inlined_call_operand.vmem [shape: f32[4,64], index: 4, kind: input, shape index: {}]   ;;  %s1425_s5 = inlined_call_operand.hbm [shape: f32[8,8], index: 5, kind: output, shape index: {}]  }
   0x1   :  { %11 = vsyncpa [#allocation6], 0 }
   0x2   :  { %12 = vsyncpa [#allocation4], 0  ;;  %s1238_s18 = smov [#allocation5]   ;;  %s1144_s22 = scalar_lea.hbm %s1421_s1, 2048 }
   0x3   :  { %s28_s19 = sshll.u32 %s1238_s18, 4  ;;  %p1145_p0 = scmp.ne.s32.totalorder %s1421_s1, %s1144_s22  ;;  %s29_s19 = int_to_ptr.vmem [resolvable:$true] %s28_s19 }
   0x4   :  { %p1148_p1 = scmp.lt.u32.totalorder %s1144_s22, %s1421_s1 }
   0x6   :  { %p1150_p2 = pnand %p1148_p1, %p1145_p0 }
   0x8   :  { %1153 = shalt.err (!%p1150_p2)
}
   0x9   :  { %s1154_s27 = scalar_lea.vmem %s29_s19, 2048  ;;  %p1159_p4 = scmp.lt.s32.totalorder %s29_s19, %s29_s19 }
   0xa   :  { %p1155_p3 = scmp.ne.s32.totalorder %s29_s19, %s1154_s27  ;;  %p1160_p5 = scmp.lt.s32.totalorder %s1154_s27, %s1154_s27 }
   0xc   :  { %p1161_p6 = por %p1160_p5, %p1159_p4 }
   0xe   :  { %p1162_p7 = pnand %p1161_p6, %p1155_p3 }
  0x10   :  { %1165 = shalt.err (!%p1162_p7)
}
  0x11   :  { %s1239_s28 = smov 128   ;;  %s1240_s29 = smov 8  }
  0x12   :  { %34 = dma.hbm_to_vmem [thread:$0]  %s1421_s1, 2048, %s29_s19, [#allocation6], %s1239_s28, %s1239_s28, %s1240_s29  }
  0x13   :  { %s1241_s7 = smov [#allocation2]   ;;  %s1242_s9 = smov [#allocation7]  }
  0x14   :  { %s19_s8 = sshll.u32 %s1241_s7, 4  ;;  %s42_s10 = sshll.u32 %s1242_s9, 4  ;;  %s20_s8 = int_to_ptr.vmem [resolvable:$true] %s19_s8  ;;  %s43_s10 = int_to_ptr.vmem [resolvable:$true] %s42_s10 }
  0x15   :  { %s1166_s13 = scalar_lea.hbm %s1420_s0, 128 }
  0x16   :  { %p1167_p8 = scmp.ne.s32.totalorder %s1420_s0, %s1166_s13  ;;  %p1170_p9 = scmp.lt.u32.totalorder %s1166_s13, %s1420_s0 }
  0x18   :  { %p1172_p10 = pnand %p1170_p9, %p1167_p8 }
  0x1a   :  { %1175 = shalt.err (!%p1172_p10)
}
  0x1b   :  { %s1176_s1 = scalar_lea.vmem %s20_s8, 128  ;;  %p1181_p12 = scmp.lt.s32.totalorder %s20_s8, %s20_s8 }
  0x1c   :  { %p1177_p11 = scmp.ne.s32.totalorder %s20_s8, %s1176_s1  ;;  %p1182_p13 = scmp.lt.s32.totalorder %s1176_s1, %s1176_s1 }
  0x1e   :  { %p1183_p0 = por %p1182_p13, %p1181_p12 }
  0x20   :  { %p1184_p1 = pnand %p1183_p0, %p1177_p11 }
  0x22   :  { %1187 = shalt.err (!%p1184_p1)
}
  0x23   :  { %22 = dma.hbm_to_vmem [thread:$0]  %s1420_s0, 128, %s20_s8, [#allocation3]  }
  0x24   :  { %s1188_s22 = scalar_lea.hbm %s1423_s3, 4096 }
  0x25   :  { %p1189_p2 = scmp.ne.s32.totalorder %s1423_s3, %s1188_s22  ;;  %p1192_p3 = scmp.lt.u32.totalorder %s1188_s22, %s1423_s3 }
  0x27   :  { %p1194_p4 = pnand %p1192_p3, %p1189_p2 }
  0x29   :  { %1197 = shalt.err (!%p1194_p4)
}
  0x2a   :  { %s1198_s27 = scalar_lea.vmem %s43_s10, 4096  ;;  %p1203_p6 = scmp.lt.s32.totalorder %s43_s10, %s43_s10 }
  0x2b   :  { %p1199_p5 = scmp.ne.s32.totalorder %s43_s10, %s1198_s27  ;;  %p1204_p7 = scmp.lt.s32.totalorder %s1198_s27, %s1198_s27 }
  0x2d   :  { %p1205_p8 = por %p1204_p7, %p1203_p6 }
  0x2f   :  { %p1206_p9 = pnand %p1205_p8, %p1199_p5 }
  0x31   :  { %1209 = shalt.err (!%p1206_p9)
}
  0x32   :  { %48 = dma.hbm_to_vmem [thread:$0]  %s1423_s3, 4096, %s43_s10, [#allocation6], %s1239_s28, %s1239_s28, %s1240_s29  }
  0x33   :  { %1232 = dma.done.wait [#allocation3], 128  }
  0x34   :  { %1233 = vsyncadd [#allocation3], 4294967168 }
  0x35   :  { %1234 = dma.done.wait [#allocation6], 6144  }
  0x36   :  { %1235 = vsyncadd [#allocation6], 4294961152  ;;  %v1243_v0 = vmov 0.0|0.0   ;;  %vm1244_vm0 = vmmov 0   ;;  %v1245_v1 = vmov 0.0   ;;  %v61_v2 = vld [vmem:[#allocation5] sm:$0xff] }
  0x37   :  { %1042 = vmatprep.subr.bf16.mxu0 %v1243_v0  ;;  %938 = vmatprep.mubr.msk.f32.mxu0 %vm1244_vm0, %v1245_v1  ;;  %v62_v3 = vld [vmem:[#allocation5 + $0x8] sm:$0xff]  ;;  %v63_v4 = vld [vmem:[#allocation5 + $0x10] sm:$0xff]  ;;  %v64_v6 = vld [vmem:[#allocation5 + $0x18] sm:$0xff]  ;;  %vm70_vm1 = vcmask 261120   ;;  %s1246_s29 = smov 32   ;;  %s1247_s6 = smov 64  }
  0x38   :  { %1048 = vmatprep.subr.bf16.mxu1 %v1243_v0  ;;  %949 = vmatprep.mubr.msk.f32.mxu1 %vm1244_vm0, %v1245_v1  ;;  %v1043_v5 = vpack.c.bf16 %v62_v3, %v61_v2  ;;  %v1046_v7 = vpack.c.bf16 %v64_v6, %v63_v4  ;;  %v60_v8 = vld [vmem:[#allocation2] sm:$0xff]  ;;  %v168_v21 = vld [vmem:[#allocation5 + $0x20] sm:$0xff]  ;;  %v169_v22 = vld [vmem:[#allocation5 + $0x28] sm:$0xff]  ;;  %s1248_s7 = smov 96   ;;  %vm590_vm2 = vcmask 523264   ;;  %s1249_s20 = smov [#allocation8]  }
  0x39   :  { %v858_v9 = vld [vmem:[%s1422_s2] ss:$0 sm:$0xff]  ;;  %v170_v23 = vld [vmem:[#allocation5 + $0x30] sm:$0xff]  ;;  %v1049_v24 = vpack.c.bf16 %v169_v22, %v168_v21  ;;  %v861_v32 = vld [vmem:[%s1422_s2 + $0x1] ss:$0 sm:$0xff]  ;;  %s848_s21 = sshll.u32 %s1249_s20, 4  ;;  %s849_s21 = int_to_ptr.vmem [resolvable:$true] %s848_s21 }
  0x3a   :  { %1044 = vmatpush3.bf16.msra.mxu0 %v1043_v5  ;;  %v171_v25 = vld [vmem:[#allocation5 + $0x38] sm:$0xff]  ;;  %v276_v44 = vld [vmem:[#allocation5 + $0x40] sm:$0xff]  ;;  %v277_v45 = vld [vmem:[#allocation5 + $0x48] sm:$0xff]  ;;  %vm840_vm3 = vcmask 64512   ;;  %s1210_s22 = scalar_lea.vmem %s849_s21, 128  ;;  %p1215_p11 = scmp.lt.s32.totalorder %s849_s21, %s849_s21 }
  0x3b   :  { %1045 = vmatprep.subr.bf16.mxu0 %v1243_v0  ;;  %1050 = vmatpush3.bf16.msra.mxu1 %v1049_v24  ;;  %v1052_v26 = vpack.c.bf16 %v171_v25, %v170_v23  ;;  %v278_v46 = vld [vmem:[#allocation5 + $0x50] sm:$0xff]  ;;  %v1055_v47 = vpack.c.bf16 %v277_v45, %v276_v44  ;;  %v279_v48 = vld [vmem:[#allocation5 + $0x58] sm:$0xff]  ;;  %v384_v5 = vld [vmem:[#allocation5 + $0x60] sm:$0xff]  ;;  %p1211_p10 = scmp.ne.s32.totalorder %s849_s21, %s1210_s22  ;;  %p1216_p12 = scmp.lt.s32.totalorder %s1210_s22, %s1210_s22 }
  0x3c   :  { %1051 = vmatprep.subr.bf16.mxu1 %v1243_v0  ;;  %v1058_v49 = vpack.c.bf16 %v279_v48, %v278_v46  ;;  %v864_v55 = vld [vmem:[%s1422_s2 + $0x2] ss:$0 sm:$0xff]  ;;  %v385_v6 = vld [vmem:[#allocation5 + $0x68] sm:$0xff]  ;;  %v583_v48 = vld [vmem:[#allocation7 + $0x70] sm:$0xff] }
  0x3d   :  { %p1217_p13 = por %p1216_p12, %p1215_p11 }
  0x3e   :  { %1047 = vmatpush3.bf16.msra.mxu0 %v1046_v7  ;;  %v386_v7 = vld [vmem:[#allocation5 + $0x70] sm:$0xff] }
  0x3f   :  { %1054 = vmatprep.subr.bf16.mxu0 %v1243_v0  ;;  %1053 = vmatpush3.bf16.msra.mxu1 %v1052_v26  ;;  %p1218_p0 = pnand %p1217_p13, %p1211_p10 }
  0x40   :  { %1060 = vmatprep.subr.bf16.mxu1 %v1243_v0 }
  0x41   :  { %939 = vmatmul.mubr.msk.f32.vlgmr.msra.gmra.mrb[0].mxu0 %vm70_vm1, %v60_v8  ;;  %v1061_v8 = vpack.c.bf16 %v385_v6, %v384_v5  ;;  %v754_v6 = vld [vmem:[#allocation7 + $0xc0] sm:$0xff] }
  0x42   :  { %960 = vmatprep.mubr.msk.f32.mxu0 %vm1244_vm0, %v1245_v1  ;;  %1056 = vmatpush3.bf16.msra.mxu0 %v1055_v47 }
  0x43   :  { %1057 = vmatprep.subr.bf16.mxu0 %v1243_v0 }
  0x46   :  { %1059 = vmatpush3.bf16.msra.mxu0 %v1058_v49  ;;  %v584_v49 = vld [vmem:[#allocation7 + $0x78] sm:$0xff] }
  0x47   :  { %1066 = vmatprep.subr.bf16.mxu0 %v1243_v0 }
 0x114   :  { %v140_v10 = vpop.f32.mrb[0].mxu0 }
 0x115   :  { %v141_v11 = vadd.f32 %v858_v9, %v140_v10  ;;  %v940_v12 = vpop.f32.mrb[1].mxu0  ;;  %v387_v9 = vld [vmem:[#allocation5 + $0x78] sm:$0xff] }
 0x116   :  { %v1064_v10 = vpack.c.bf16 %v387_v9, %v386_v7  ;;  %v755_v7 = vld [vmem:[#allocation7 + $0xc8] sm:$0xff] }
 0x117   :  { %151 = vrot.lane.b32.xlu0 %v141_v11, %s1246_s29  ;;  %v860_v13 = vmul.f32 -1.442695, %v141_v11  ;;  %v1097_v9 = vpack.c.bf16 %v755_v7, %v754_v6 }
 0x119   :  { %1120 = vpow2.f32 %v860_v13 }
 0x123   :  { %v1121_v14 = vpop.eup %1120 }
 0x124   :  { %v147_v15 = vadd.f32 1.0, %v1121_v14 }
 0x126   :  { %1122 = vrcp.f32 %v147_v15 }
 0x130   :  { %v1123_v16 = vpop.eup %1122 }
 0x131   :  { %v161_v28 = vsub.f32 1.0, %v1123_v16 }
 0x189   :  { %v152_v17 = vpop.permute.xlu0 %151 }
 0x18a   :  { %v154_v18 = vmul.f32 %v1123_v16, %v152_v17  ;;  %v867_v16 = vld [vmem:[%s1422_s2 + $0x3] ss:$0 sm:$0xff] }
 0x18c   :  { %156 = vrot.lane.b32.xlu0 %v154_v18, %s1247_s6 }
 0x1fe   :  { %v157_v19 = vpop.permute.xlu0 %156 }
 0x1ff   :  { %v159_v20 = vadd.f32 %v157_v19, %v141_v11 }
 0x201   :  { %1124 = vtanh.f32 %v159_v20 }
 0x20b   :  { %v1125_v27 = vpop.eup %1124 }
 0x20c   :  { %163 = vrot.lane.b32.xlu1 %v1125_v27, %s1248_s7 }
 0x27e   :  { %v164_v29 = vpop.permute.xlu1 %163 }
 0x27f   :  { %v166_v30 = vmul.f32 %v164_v29, %v161_v28  ;;  %v491_v28 = vld [vmem:[#allocation7] sm:$0xff]  ;;  %v492_v29 = vld [vmem:[#allocation7 + $0x8] sm:$0xff] }
 0x281   :  { %178 = vrot.lane.b32.xlu1 %v166_v30, %s1248_s7  ;;  %v493_v30 = vld [vmem:[#allocation7 + $0x10] sm:$0xff] }
 0x2f3   :  { %v179_v31 = vpop.permute.xlu1 %178 }
 0x2f4   :  { %950 = vmatmul.mubr.msk.f32.vlgmr.msra.gmra.mrb[0].mxu1 %vm70_vm1, %v179_v31  ;;  %v1067_v31 = vpack.c.bf16 %v492_v29, %v491_v28 }
 0x2f5   :  { %971 = vmatprep.mubr.msk.f32.mxu1 %vm1244_vm0, %v1245_v1  ;;  %1062 = vmatpush3.bf16.msra.mxu1 %v1061_v8  ;;  %v756_v8 = vld [vmem:[#allocation7 + $0xd0] sm:$0xff] }
 0x2f6   :  { %1063 = vmatprep.subr.bf16.mxu1 %v1243_v0 }
 0x2f9   :  { %1065 = vmatpush3.bf16.msra.mxu1 %v1064_v10  ;;  %v757_v10 = vld [vmem:[#allocation7 + $0xd8] sm:$0xff] }
 0x2fa   :  { %1072 = vmatprep.subr.bf16.mxu1 %v1243_v0 }
 0x3c7   :  { %v248_v33 = vpop.f32.mrb[0].mxu1 }
 0x3c8   :  { %v249_v34 = vadd.f32 %v861_v32, %v248_v33  ;;  %v951_v35 = vpop.f32.mrb[1].mxu1  ;;  %v494_v32 = vld [vmem:[#allocation7 + $0x18] sm:$0xff] }
 0x3c9   :  { %v1070_v33 = vpack.c.bf16 %v494_v32, %v493_v30  ;;  %v577_v35 = vld [vmem:[#allocation7 + $0x40] sm:$0xff] }
 0x3ca   :  { %259 = vrot.lane.b32.xlu0 %v249_v34, %s1246_s29  ;;  %v863_v36 = vmul.f32 -1.442695, %v249_v34 }
 0x3cc   :  { %1126 = vpow2.f32 %v863_v36  ;;  %v578_v36 = vld [vmem:[#allocation7 + $0x48] sm:$0xff] }
 0x3d6   :  { %v1127_v37 = vpop.eup %1126 }
 0x3d7   :  { %v255_v38 = vadd.f32 1.0, %v1127_v37  ;;  %v579_v37 = vld [vmem:[#allocation7 + $0x50] sm:$0xff] }
 0x3d9   :  { %1128 = vrcp.f32 %v255_v38  ;;  %v1073_v38 = vpack.c.bf16 %v578_v36, %v577_v35 }
 0x3e3   :  { %v1129_v39 = vpop.eup %1128 }
 0x3e4   :  { %v269_v51 = vsub.f32 1.0, %v1129_v39 }
 0x43c   :  { %v260_v40 = vpop.permute.xlu0 %259 }
 0x43d   :  { %v262_v41 = vmul.f32 %v1129_v39, %v260_v40  ;;  %v580_v39 = vld [vmem:[#allocation7 + $0x58] sm:$0xff] }
 0x43e   :  { %v1076_v40 = vpack.c.bf16 %v580_v39, %v579_v37 }
 0x43f   :  { %264 = vrot.lane.b32.xlu1 %v262_v41, %s1247_s6  ;;  %v581_v41 = vld [vmem:[#allocation7 + $0x60] sm:$0xff] }
 0x4b1   :  { %v265_v42 = vpop.permute.xlu1 %264 }
 0x4b2   :  { %v267_v43 = vadd.f32 %v265_v42, %v249_v34  ;;  %v582_v42 = vld [vmem:[#allocation7 + $0x68] sm:$0xff] }
 0x4b4   :  { %1130 = vtanh.f32 %v267_v43  ;;  %v1079_v43 = vpack.c.bf16 %v582_v42, %v581_v41 }
 0x4be   :  { %v1131_v50 = vpop.eup %1130 }
 0x4bf   :  { %271 = vrot.lane.b32.xlu0 %v1131_v50, %s1248_s7  ;;  %v1082_v50 = vpack.c.bf16 %v584_v49, %v583_v48 }
 0x531   :  { %v272_v52 = vpop.permute.xlu0 %271 }
 0x532   :  { %v274_v53 = vmul.f32 %v272_v52, %v269_v51  ;;  %v666_v51 = vld [vmem:[#allocation7 + $0x80] sm:$0xff]  ;;  %v667_v52 = vld [vmem:[#allocation7 + $0x88] sm:$0xff] }
 0x534   :  { %286 = vrot.lane.b32.xlu1 %v274_v53, %s1248_s7  ;;  %v668_v53 = vld [vmem:[#allocation7 + $0x90] sm:$0xff] }
 0x5a6   :  { %v287_v54 = vpop.permute.xlu1 %286 }
 0x5a7   :  { %961 = vmatmul.mubr.msk.f32.vlgmr.msra.gmra.mrb[2].mxu0 %vm70_vm1, %v287_v54  ;;  %v1085_v54 = vpack.c.bf16 %v667_v52, %v666_v51 }
 0x5a8   :  { %982 = vmatprep.mubr.msk.f32.mxu0 %vm1244_vm0, %v1245_v1  ;;  %1068 = vmatpush3.bf16.msra.mxu0 %v1067_v31 }
 0x5a9   :  { %1069 = vmatprep.subr.bf16.mxu0 %v1243_v0 }
 0x5ac   :  { %1071 = vmatpush3.bf16.msra.mxu0 %v1070_v33 }
 0x5ad   :  { %1084 = vmatprep.subr.bf16.mxu0 %v1243_v0 }
 0x67a   :  { %v356_v56 = vpop.f32.mrb[2].mxu0 }
 0x67b   :  { %v357_v57 = vadd.f32 %v864_v55, %v356_v56  ;;  %v962_v58 = vpop.f32.mrb[3].mxu0  ;;  %v669_v55 = vld [vmem:[#allocation7 + $0x98] sm:$0xff] }
 0x67c   :  { %v1088_v56 = vpack.c.bf16 %v669_v55, %v668_v53  ;;  %v671_v58 = vld [vmem:[#allocation7 + $0xa8] sm:$0xff] }
 0x67d   :  { %367 = vrot.lane.b32.xlu0 %v357_v57, %s1246_s29  ;;  %v866_v59 = vmul.f32 -1.442695, %v357_v57 }
 0x67f   :  { %1132 = vpow2.f32 %v866_v59 }
 0x689   :  { %v1133_v60 = vpop.eup %1132 }
 0x68a   :  { %v363_v61 = vadd.f32 1.0, %v1133_v60  ;;  %v870_v60 = vld [vmem:[%s1424_s4] ss:$0 sm:$0xff] }
 0x68c   :  { %1134 = vrcp.f32 %v363_v61 }
 0x696   :  { %v1135_v62 = vpop.eup %1134 }
 0x697   :  { %v377_v12 = vsub.f32 1.0, %v1135_v62 }
 0x6ef   :  { %v368_v63 = vpop.permute.xlu0 %367 }
 0x6f0   :  { %v370_v2 = vmul.f32 %v1135_v62, %v368_v63 }
 0x6f2   :  { %372 = vrot.lane.b32.xlu1 %v370_v2, %s1247_s6 }
 0x764   :  { %v373_v3 = vpop.permute.xlu1 %372 }
 0x765   :  { %v375_v4 = vadd.f32 %v373_v3, %v357_v57  ;;  %v670_v57 = vld [vmem:[#allocation7 + $0xa0] sm:$0xff]  ;;  %v672_v3 = vld [vmem:[#allocation7 + $0xb0] sm:$0xff] }
 0x766   :  { %v1091_v59 = vpack.c.bf16 %v671_v58, %v670_v57 }
 0x767   :  { %1136 = vtanh.f32 %v375_v4  ;;  %v673_v4 = vld [vmem:[#allocation7 + $0xb8] sm:$0xff] }
 0x768   :  { %v1094_v5 = vpack.c.bf16 %v673_v4, %v672_v3 }
 0x771   :  { %v1137_v11 = vpop.eup %1136 }
 0x772   :  { %379 = vrot.lane.b32.xlu0 %v1137_v11, %s1248_s7  ;;  %v1100_v11 = vpack.c.bf16 %v757_v10, %v756_v8 }
 0x7e4   :  { %v380_v13 = vpop.permute.xlu0 %379 }
 0x7e5   :  { %v382_v14 = vmul.f32 %v380_v13, %v377_v12  ;;  %v758_v12 = vld [vmem:[#allocation7 + $0xe0] sm:$0xff]  ;;  %v759_v13 = vld [vmem:[#allocation7 + $0xe8] sm:$0xff] }
 0x7e7   :  { %394 = vrot.lane.b32.xlu1 %v382_v14, %s1248_s7  ;;  %v1103_v14 = vpack.c.bf16 %v759_v13, %v758_v12 }
 0x859   :  { %v395_v15 = vpop.permute.xlu1 %394 }
 0x85a   :  { %972 = vmatmul.mubr.msk.f32.vlgmr.msra.gmra.mrb[2].mxu1 %vm70_vm1, %v395_v15 }
 0x85b   :  { %1001 = vmatprep.mubr.msk.f32.mxu1 %vm1244_vm0, %v1245_v1  ;;  %1074 = vmatpush3.bf16.msra.mxu1 %v1073_v38 }
 0x85c   :  { %1075 = vmatprep.subr.bf16.mxu1 %v1243_v0 }
 0x85f   :  { %1077 = vmatpush3.bf16.msra.mxu1 %v1076_v40 }
 0x860   :  { %1078 = vmatprep.subr.bf16.mxu1 %v1243_v0 }
 0x863   :  { %1080 = vmatpush3.bf16.msra.mxu1 %v1079_v43 }
 0x864   :  { %1081 = vmatprep.subr.bf16.mxu1 %v1243_v0 }
 0x867   :  { %1083 = vmatpush3.bf16.msra.mxu1 %v1082_v50 }
 0x868   :  { %1096 = vmatprep.subr.bf16.mxu1 %v1243_v0 }
 0x92d   :  { %v464_v17 = vpop.f32.mrb[2].mxu1 }
 0x92e   :  { %v465_v18 = vadd.f32 %v867_v16, %v464_v17  ;;  %v973_v19 = vpop.f32.mrb[3].mxu1 }
 0x92f   :  { %v760_v19 = vld [vmem:[#allocation7 + $0xf0] sm:$0xff] }
 0x930   :  { %475 = vrot.lane.b32.xlu0 %v465_v18, %s1246_s29  ;;  %v869_v20 = vmul.f32 -1.442695, %v465_v18 }
 0x932   :  { %1138 = vpow2.f32 %v869_v20  ;;  %v761_v20 = vld [vmem:[#allocation7 + $0xf8] sm:$0xff] }
 0x93c   :  { %v1139_v21 = vpop.eup %1138 }
 0x93d   :  { %v471_v22 = vadd.f32 1.0, %v1139_v21  ;;  %v1106_v21 = vpack.c.bf16 %v761_v20, %v760_v19 }
 0x93f   :  { %1140 = vrcp.f32 %v471_v22  ;;  %v874_v22 = vld [vmem:[%s1424_s4 + $0x2] ss:$0 sm:$0xff] }
 0x949   :  { %v1141_v23 = vpop.eup %1140 }
 0x94a   :  { %v485_v44 = vsub.f32 1.0, %v1141_v23 }
 0x9a2   :  { %v476_v24 = vpop.permute.xlu0 %475 }
 0x9a3   :  { %v478_v25 = vmul.f32 %v1141_v23, %v476_v24 }
 0x9a5   :  { %480 = vrot.lane.b32.xlu1 %v478_v25, %s1247_s6 }
 0xa17   :  { %v481_v26 = vpop.permute.xlu1 %480 }
 0xa18   :  { %v483_v27 = vadd.f32 %v481_v26, %v465_v18  ;;  %v876_v26 = vld [vmem:[%s1424_s4 + $0x3] ss:$0 sm:$0xff] }
 0xa1a   :  { %1142 = vtanh.f32 %v483_v27 }
 0xa24   :  { %v1143_v34 = vpop.eup %1142 }
 0xa25   :  { %487 = vrot.lane.b32.xlu0 %v1143_v34, %s1248_s7 }
 0xa97   :  { %v488_v45 = vpop.permute.xlu0 %487 }
 0xa98   :  { %v490_v46 = vmul.f32 %v488_v45, %v485_v44 }
 0xa9a   :  { %501 = vrot.lane.b32.xlu1 %v490_v46, %s1248_s7 }
 0xb0c   :  { %v502_v47 = vpop.permute.xlu1 %501 }
 0xb0d   :  { %983 = vmatmul.mubr.msk.f32.vlgmr.msra.gmra.mrb[4].mxu0 %vm70_vm1, %v502_v47 }
 0xb0e   :  { %1020 = vmatprep.mubr.msk.f32.mxu0 %vm1244_vm0, %v1245_v1  ;;  %1086 = vmatpush3.bf16.msra.mxu0 %v1085_v54 }
 0xb0f   :  { %1087 = vmatprep.subr.bf16.mxu0 %v1243_v0 }
 0xb12   :  { %1089 = vmatpush3.bf16.msra.mxu0 %v1088_v56 }
 0xb13   :  { %1090 = vmatprep.subr.bf16.mxu0 %v1243_v0 }
 0xb16   :  { %1092 = vmatpush3.bf16.msra.mxu0 %v1091_v59 }
 0xb17   :  { %1093 = vmatprep.subr.bf16.mxu0 %v1243_v0 }
 0xb1a   :  { %1095 = vmatpush3.bf16.msra.mxu0 %v1094_v5 }
 0xbe0   :  { %v571_v61 = vpop.f32.mrb[4].mxu0 }
 0xbe1   :  { %v572_v62 = vadd.f32 %v870_v60, %v571_v61  ;;  %v984_v63 = vpop.f32.mrb[5].mxu0 }
 0xbe3   :  { %v575_v2 = vmax.f32 %v572_v62, 0.0 }
 0xbe5   :  { %1002 = vmatmul.mubr.msk.f32.vlgmr.msra.gmra.mrb[4].mxu1 %vm590_vm2, %v575_v2 }
 0xbe6   :  { %1039 = vmatprep.mubr.msk.f32.mxu1 %vm1244_vm0, %v1245_v1  ;;  %1098 = vmatpush3.bf16.msra.mxu1 %v1097_v9  ;;  %v872_v1 = vld [vmem:[%s1424_s4 + $0x1] ss:$0 sm:$0xff] }
 0xbe7   :  { %1099 = vmatprep.subr.bf16.mxu1 %v1243_v0 }
 0xbea   :  { %1101 = vmatpush3.bf16.msra.mxu1 %v1100_v11 }
 0xbeb   :  { %1102 = vmatprep.subr.bf16.mxu1 %v1243_v0 }
 0xbee   :  { %1104 = vmatpush3.bf16.msra.mxu1 %v1103_v14 }
 0xbef   :  { %1105 = vmatprep.subr.bf16.mxu1 %v1243_v0 }
 0xbf2   :  { %1107 = vmatpush3.bf16.msra.mxu1 %v1106_v21 }
 0xcb8   :  { %v660_v15 = vpop.f32.mrb[4].mxu1 }
 0xcb9   :  { %v661_v16 = vadd.f32 %v872_v1, %v660_v15  ;;  %v1003_v17 = vpop.f32.mrb[5].mxu1 }
 0xcbb   :  { %v664_v18 = vmax.f32 %v661_v16, 0.0 }
 0xcbd   :  { %1021 = vmatmul.mubr.msk.f32.vlgmr.msra.gmra.mrb[6].mxu0 %vm590_vm2, %v664_v18 }
 0xd90   :  { %v748_v23 = vpop.f32.mrb[6].mxu0 }
 0xd91   :  { %v749_v0 = vadd.f32 %v874_v22, %v748_v23  ;;  %v1022_v24 = vpop.f32.mrb[7].mxu0 }
 0xd93   :  { %v752_v25 = vmax.f32 %v749_v0, 0.0 }
 0xd95   :  { %1040 = vmatmul.mubr.msk.f32.vlgmr.msra.gmra.mrb[6].mxu1 %vm590_vm2, %v752_v25 }
 0xe68   :  { %v836_v27 = vpop.f32.mrb[6].mxu1 }
 0xe69   :  { %v837_v28 = vadd.f32 %v876_v26, %v836_v27  ;;  %v1041_v29 = vpop.f32.mrb[7].mxu1 }
 0xe6b   :  { %841 = vst.msk [vmem:[#allocation8] sm:$0xff] %vm840_vm3, %v837_v28 }
 0xe6c   :  { %1221 = shalt.err (!%p1218_p0)
}
 0xe6d   :  { %s1222_s25 = scalar_lea.hbm %s1425_s5, 128 }
 0xe6e   :  { %p1223_p1 = scmp.ne.s32.totalorder %s1425_s5, %s1222_s25  ;;  %p1226_p2 = scmp.lt.u32.totalorder %s1222_s25, %s1425_s5 }
 0xe70   :  { %p1228_p3 = pnand %p1226_p2, %p1223_p1 }
 0xe72   :  { %1231 = shalt.err (!%p1228_p3)
}
 0xe73   :  { %851 = dma.vmem_to_hbm [thread:$0]  %s849_s21, 128, %s1425_s5, [#allocation4]  }
 0xe74   :  { %1236 = dma.done.wait [#allocation4], 128  }
 0xe75   :  { %1237 = vsyncadd [#allocation4], 4294967168 }
 0xe76   :  { %855 = vsyncpa [#allocation3], 1 }
 0xe77   :  { %856 = vsyncpa [#allocation6], 1 }
 0xe78   :  { %857 = vsyncpa [#allocation4], 1 }

</bundles_post_ra>
